<compile_context>
chip_gen: v6e
topology: v6e:2x2x1
jax: 0.10.0
libtpu: 0.0.40
codegen_flags: <defaults>
</compile_context>

<pallas_src>
import functools

import jax
import jax.numpy as jnp
from jax.experimental import pallas as pl
from jax.experimental.pallas import tpu as pltpu


def _round_up(x, m):
    return (x + m - 1) // m * m


def _tensorcores_per_chip():
    """v7x has 2 TensorCores per chip; v5e/v6e have 1 (used only to pick the grid)."""
    try:
        kind = jax.devices()[0].device_kind.lower()
    except Exception:
        return 1
    return 2 if ("v7" in kind or "7x" in kind) else 1


def deconv_instnorm_kernel(patches_ref, w_ref, gb_ref, out_ref, *, spatial):
    # patches_ref: (CKK_pad, G*P) bf16 -- im2col of dilated/padded input, G samples
    # w_ref:       (Cout, CKK_pad) bf16 -- flipped ConvTranspose2d weight (zero-padded)
    # gb_ref:      (Cout, 2)       f32  -- [:, 0] = gamma, [:, 1] = beta
    # out_ref:     (G, Cout, P)    f32  -- lane-dense output (P multiple of 128)
    x = patches_ref[...]
    w = w_ref[...]
    # One MXU matmul covers all G samples in the block: (Cout,CKK_pad)@(CKK_pad,G*P).
    y = jnp.dot(w, x, preferred_element_type=jnp.float32)        # (Cout, G*P) f32
    # NOTE: conv bias omitted on purpose -- a per-channel constant is exactly
    # cancelled by the instance-norm mean subtraction below.
    gamma = gb_ref[:, 0:1]                                       # (Cout, 1)
    beta = gb_ref[:, 1:2]                                        # (Cout, 1)
    inv_p = 1.0 / spatial
    num_samples = out_ref.shape[0]
    for g in range(num_samples):           # static unroll; lane-tile-aligned slices
        yg = y[:, g * spatial:(g + 1) * spatial]                 # (Cout, P)
        mean = jnp.sum(yg, axis=1, keepdims=True) * inv_p        # (Cout, 1)
        centered = yg - mean
        var = jnp.sum(centered * centered, axis=1, keepdims=True) * inv_p
        scale = jax.lax.rsqrt(var + 1e-5) * gamma                # (Cout, 1)
        out_ref[g] = (centered * scale + beta).astype(out_ref.dtype)


def deconvolutional_layer_forward(x, weight, bias, gamma, beta,
                                  kernel_size, stride, output_padding):
    """x: (N, Cin, H, W); weight: (Cin, Cout, k, k) (PyTorch ConvTranspose2d layout)."""
    del bias  # per-channel bias is mathematically cancelled by instance-norm mean sub
    N, Cin, H, W = x.shape
    k = kernel_size
    Cout = weight.shape[1]
    pad = k // 2

    Ho = (H - 1) * stride - 2 * pad + k + output_padding
    Wo = (W - 1) * stride - 2 * pad + k + output_padding
    P = Ho * Wo
    CKK = Cin * k * k
    CKK_pad = _round_up(CKK, 16)          # bf16 sublane tile

    # ConvTranspose2d == stride-1 conv of the flipped weight over the lhs-dilated,
    # edge-padded input.  One fused XLA op builds the im2col patches directly in the
    # lane-dense (CKK, N, Ho, Wo) layout; the channel-major feature ordering matches
    # the (Cout, Cin*k*k) weight reshape.
    lo = k - 1 - pad
    hi = lo + output_padding
    patches = jax.lax.conv_general_dilated_patches(
        x.astype(jnp.bfloat16),
        filter_shape=(k, k),
        window_strides=(1, 1),
        padding=[(lo, hi), (lo, hi)],
        lhs_dilation=(stride, stride),
        dimension_numbers=("NCHW", "OIHW", "CNHW"),
    )                                                         # (CKK, N, Ho, Wo) bf16
    patches = patches.reshape(CKK, N * P)
    patches = jnp.pad(patches, ((0, CKK_pad - CKK), (0, 0)))  # zero taps add nothing

    # Flip + transpose ConvTranspose2d weight into matmul layout (Cout, CKK_pad).
    w_conv = jnp.flip(weight, axis=(2, 3)).transpose(1, 0, 2, 3)
    w_mat = jnp.pad(w_conv.reshape(Cout, CKK), ((0, 0), (0, CKK_pad - CKK)))
    w_mat = w_mat.astype(jnp.bfloat16)

    gb = jnp.stack([gamma, beta], axis=1).astype(jnp.float32)    # (Cout, 2)

    # Grid decomposition: one parallel step per TensorCore (v7x: 2, v5e/v6e: 1),
    # remaining batch folded into the lane dimension of each block.
    tc = _tensorcores_per_chip()
    num_blocks = tc if (tc > 1 and N % tc == 0) else 1
    G = N // num_blocks                                          # samples per block

    cost = pl.CostEstimate(
        flops=2 * N * Cout * CKK_pad * P,
        transcendentals=N * Cout,                                # rsqrt per (n, c)
        bytes_accessed=(CKK_pad * N * P * 2 + Cout * CKK_pad * 2
                        + Cout * 2 * 4 + N * Cout * P * 4),
    )

    out_flat = pl.pallas_call(
        functools.partial(deconv_instnorm_kernel, spatial=P),
        out_shape=jax.ShapeDtypeStruct((N, Cout, P), jnp.float32),
        grid_spec=pltpu.PrefetchScalarGridSpec(
            num_scalar_prefetch=0,
            grid=(num_blocks,),
            in_specs=[
                pl.BlockSpec((CKK_pad, G * P), lambda b: (0, b)),
                pl.BlockSpec((Cout, CKK_pad), lambda b: (0, 0)),
                pl.BlockSpec((Cout, 2), lambda b: (0, 0)),
            ],
            out_specs=pl.BlockSpec((G, Cout, P), lambda b: (b, 0, 0)),
        ),
        compiler_params=pltpu.CompilerParams(dimension_semantics=("parallel",)),
        cost_estimate=cost,
    )(patches, w_mat, gb)

    # (N, Cout, P) -> NCHW: pure reshape, no transpose.
    return out_flat.reshape(N, Cout, Ho, Wo)


def _reference(x, weight, bias, gamma, beta, kernel_size, stride, output_padding):
    # Pure-JAX reference: ConvTranspose2d (incl. bias) + InstanceNorm2d(affine).
    # Conv operands cast to bf16 to mirror the kernel's MXU precision.
    k = kernel_size
    pad = k // 2
    lo = k - 1 - pad
    hi = lo + output_padding
    w_conv = jnp.flip(weight, axis=(2, 3)).transpose(1, 0, 2, 3)  # (Cout, Cin, k, k)
    y = jax.lax.conv_general_dilated(
        x.astype(jnp.bfloat16), w_conv.astype(jnp.bfloat16),
        window_strides=(1, 1), padding=[(lo, hi), (lo, hi)],
        lhs_dilation=(stride, stride),
        dimension_numbers=("NCHW", "OIHW", "NCHW"),
        preferred_element_type=jnp.float32)
    y = y + bias.reshape(1, -1, 1, 1)
    mean = jnp.mean(y, axis=(2, 3), keepdims=True)
    var = jnp.mean((y - mean) ** 2, axis=(2, 3), keepdims=True)
    yn = (y - mean) * jax.lax.rsqrt(var + 1e-5)
    return yn * gamma.reshape(1, -1, 1, 1) + beta.reshape(1, -1, 1, 1)


if __name__ == "__main__":
    # Small shapes consistent with the module: batch=2, in_channels=4, out_channels=8,
    # kernel_size=3, stride=2, output_padding=1, input spatial 8 -> output spatial 16.
    N, Cin, H, W = 2, 4, 8, 8
    Cout, k, stride, output_padding = 8, 3, 2, 1

    key = jax.random.PRNGKey(0)
    kx, kw, kb = jax.random.split(key, 3)
    x = jax.random.normal(kx, (N, Cin, H, W), dtype=jnp.float32)

    # Deterministic parameter init (PyTorch ConvTranspose2d weight layout (Cin, Cout, k, k)).
    fan = Cin * k * k
    bound = 1.0 / (fan ** 0.5)
    weight = jax.random.uniform(kw, (Cin, Cout, k, k), jnp.float32, -bound, bound)
    bias = jax.random.uniform(kb, (Cout,), jnp.float32, -bound, bound)
    gamma = jnp.ones((Cout,), jnp.float32)   # InstanceNorm2d affine default init
    beta = jnp.zeros((Cout,), jnp.float32)

    fwd = jax.jit(deconvolutional_layer_forward, static_argnums=(5, 6, 7))
    out = fwd(x, weight, bias, gamma, beta, k, stride, output_padding)
    out = jax.block_until_ready(out)

    H_out = (H - 1) * stride - 2 * (k // 2) + k + output_padding
    assert out.shape == (N, Cout, H_out, H_out), out.shape

    ref = _reference(x, weight, bias, gamma, beta, k, stride, output_padding)
    assert jnp.allclose(out, ref, atol=1e-3, rtol=1e-3), float(jnp.max(jnp.abs(out - ref)))

    print("KERNEL_OK")
</pallas_src>

<mosaic_0001>
module attributes {stable_mosaic.version = 11 : i64} {
  func.func @deconv_instnorm_kernel(%arg0: i32, %arg1: memref<48x512xbf16, #tpu.memory_space<vmem>>, %arg2: memref<8x48xbf16, #tpu.memory_space<vmem>>, %arg3: memref<8x2xf32, #tpu.memory_space<vmem>>, %arg4: memref<2x8x256xf32, #tpu.memory_space<vmem>>) attributes {dimension_semantics = [#tpu.dimension_semantics<parallel>], iteration_bounds = array<i64: 1>, scalar_prefetch = 0 : i64, scratch_operands = 0 : i64, tpu.core_type = #tpu.core_type<tc>, window_params = [{transform_indices = @transform_0, window_bounds = array<i64: 48, 512>}, {pipeline_mode = #tpu.pipeline_mode<synchronous>, transform_indices = @transform_1, window_bounds = array<i64: 8, 48>}, {pipeline_mode = #tpu.pipeline_mode<synchronous>, transform_indices = @transform_2, window_bounds = array<i64: 8, 2>}, {transform_indices = @transform_3, window_bounds = array<i64: 2, 8, 256>}]} {
    %c0 = arith.constant 0 : index
    %c0_0 = arith.constant 0 : index
    %0 = vector.load %arg1[%c0, %c0_0] : memref<48x512xbf16, #tpu.memory_space<vmem>>, vector<48x512xbf16>
    %c0_1 = arith.constant 0 : index
    %c0_2 = arith.constant 0 : index
    %1 = vector.load %arg2[%c0_1, %c0_2] : memref<8x48xbf16, #tpu.memory_space<vmem>>, vector<8x48xbf16>
    %cst = arith.constant dense<0.000000e+00> : vector<8x512xf32>
    %2 = tpu.matmul %1, %0, %cst {dimension_numbers = #tpu.dot_dimension_numbers<[1], [0], [0], [1], [0, 0, 1, 1], [], []>} : vector<8x48xbf16>, vector<48x512xbf16>, vector<8x512xf32> -> vector<8x512xf32>
    %c0_3 = arith.constant 0 : index
    %c0_4 = arith.constant 0 : index
    %3 = vector.load %arg3[%c0_3, %c0_4] : memref<8x2xf32, #tpu.memory_space<vmem>>, vector<8x1xf32>
    %c0_5 = arith.constant 0 : index
    %c1 = arith.constant 1 : index
    %4 = vector.load %arg3[%c0_5, %c1] : memref<8x2xf32, #tpu.memory_space<vmem>>, vector<8x1xf32>
    %5 = vector.extract_strided_slice %2 {offsets = [0, 0], sizes = [8, 256], strides = [1, 1]} : vector<8x512xf32> to vector<8x256xf32>
    %cst_6 = arith.constant dense<0.000000e+00> : vector<8xf32>
    %6 = vector.multi_reduction <add>, %5, %cst_6 [1] : vector<8x256xf32> to vector<8xf32>
    %7 = vector.shape_cast %6 : vector<8xf32> to vector<8x1xf32>
    %cst_7 = arith.constant 3.906250e-03 : f32
    %8 = vector.broadcast %cst_7 : f32 to vector<8x1xf32>
    %9 = arith.mulf %7, %8 : vector<8x1xf32>
    %10 = vector.broadcast %9 : vector<8x1xf32> to vector<8x256xf32>
    %11 = arith.subf %5, %10 : vector<8x256xf32>
    %12 = arith.mulf %11, %11 : vector<8x256xf32>
    %cst_8 = arith.constant dense<0.000000e+00> : vector<8xf32>
    %13 = vector.multi_reduction <add>, %12, %cst_8 [1] : vector<8x256xf32> to vector<8xf32>
    %14 = vector.shape_cast %13 : vector<8xf32> to vector<8x1xf32>
    %cst_9 = arith.constant 3.906250e-03 : f32
    %15 = vector.broadcast %cst_9 : f32 to vector<8x1xf32>
    %16 = arith.mulf %14, %15 : vector<8x1xf32>
    %cst_10 = arith.constant 9.99999974E-6 : f32
    %17 = vector.broadcast %cst_10 : f32 to vector<8x1xf32>
    %18 = arith.addf %16, %17 : vector<8x1xf32>
    %19 = math.rsqrt %18 : vector<8x1xf32>
    %20 = arith.mulf %19, %3 : vector<8x1xf32>
    %21 = vector.broadcast %20 : vector<8x1xf32> to vector<8x256xf32>
    %22 = arith.mulf %11, %21 : vector<8x256xf32>
    %23 = vector.broadcast %4 : vector<8x1xf32> to vector<8x256xf32>
    %24 = arith.addf %22, %23 : vector<8x256xf32>
    %c0_11 = arith.constant 0 : index
    %c0_12 = arith.constant 0 : index
    %c0_13 = arith.constant 0 : index
    %25 = vector.load %arg4[%c0_11, %c0_12, %c0_13] : memref<2x8x256xf32, #tpu.memory_space<vmem>>, vector<1x8x256xf32>
    %26 = vector.shape_cast %25 : vector<1x8x256xf32> to vector<8x256xf32>
    %27 = vector.shape_cast %24 : vector<8x256xf32> to vector<1x8x256xf32>
    tpu.vector_store %arg4[%c0_11, %c0_12, %c0_13], %27 {strides = array<i32>} : memref<2x8x256xf32, #tpu.memory_space<vmem>>, vector<1x8x256xf32>,
    %28 = vector.extract_strided_slice %2 {offsets = [0, 256], sizes = [8, 256], strides = [1, 1]} : vector<8x512xf32> to vector<8x256xf32>
    %cst_14 = arith.constant dense<0.000000e+00> : vector<8xf32>
    %29 = vector.multi_reduction <add>, %28, %cst_14 [1] : vector<8x256xf32> to vector<8xf32>
    %30 = vector.shape_cast %29 : vector<8xf32> to vector<8x1xf32>
    %cst_15 = arith.constant 3.906250e-03 : f32
    %31 = vector.broadcast %cst_15 : f32 to vector<8x1xf32>
    %32 = arith.mulf %30, %31 : vector<8x1xf32>
    %33 = vector.broadcast %32 : vector<8x1xf32> to vector<8x256xf32>
    %34 = arith.subf %28, %33 : vector<8x256xf32>
    %35 = arith.mulf %34, %34 : vector<8x256xf32>
    %cst_16 = arith.constant dense<0.000000e+00> : vector<8xf32>
    %36 = vector.multi_reduction <add>, %35, %cst_16 [1] : vector<8x256xf32> to vector<8xf32>
    %37 = vector.shape_cast %36 : vector<8xf32> to vector<8x1xf32>
    %cst_17 = arith.constant 3.906250e-03 : f32
    %38 = vector.broadcast %cst_17 : f32 to vector<8x1xf32>
    %39 = arith.mulf %37, %38 : vector<8x1xf32>
    %cst_18 = arith.constant 9.99999974E-6 : f32
    %40 = vector.broadcast %cst_18 : f32 to vector<8x1xf32>
    %41 = arith.addf %39, %40 : vector<8x1xf32>
    %42 = math.rsqrt %41 : vector<8x1xf32>
    %43 = arith.mulf %42, %3 : vector<8x1xf32>
    %44 = vector.broadcast %43 : vector<8x1xf32> to vector<8x256xf32>
    %45 = arith.mulf %34, %44 : vector<8x256xf32>
    %46 = vector.broadcast %4 : vector<8x1xf32> to vector<8x256xf32>
    %47 = arith.addf %45, %46 : vector<8x256xf32>
    %c1_19 = arith.constant 1 : index
    %c0_20 = arith.constant 0 : index
    %c0_21 = arith.constant 0 : index
    %48 = vector.load %arg4[%c1_19, %c0_20, %c0_21] : memref<2x8x256xf32, #tpu.memory_space<vmem>>, vector<1x8x256xf32>
    %49 = vector.shape_cast %48 : vector<1x8x256xf32> to vector<8x256xf32>
    %50 = vector.shape_cast %47 : vector<8x256xf32> to vector<1x8x256xf32>
    tpu.vector_store %arg4[%c1_19, %c0_20, %c0_21], %50 {strides = array<i32>} : memref<2x8x256xf32, #tpu.memory_space<vmem>>, vector<1x8x256xf32>,
    return
  }
  func.func @transform_0(%arg0: i32) -> (i32, i32) {
    %c0_i32 = arith.constant 0 : i32
    %c0_i32_0 = arith.constant 0 : i32
    return %c0_i32, %arg0 : i32, i32
  }
  func.func @transform_1(%arg0: i32) -> (i32, i32) {
    %c0_i32 = arith.constant 0 : i32
    %c0_i32_0 = arith.constant 0 : i32
    %c0_i32_1 = arith.constant 0 : i32
    return %c0_i32, %c0_i32_0 : i32, i32
  }
  func.func @transform_2(%arg0: i32) -> (i32, i32) {
    %c0_i32 = arith.constant 0 : i32
    %c0_i32_0 = arith.constant 0 : i32
    %c0_i32_1 = arith.constant 0 : i32
    return %c0_i32, %c0_i32_0 : i32, i32
  }
  func.func @transform_3(%arg0: i32) -> (i32, i32, i32) {
    %c0_i32 = arith.constant 0 : i32
    %c0_i32_0 = arith.constant 0 : i32
    %c0_i32_1 = arith.constant 0 : i32
    return %arg0, %c0_i32, %c0_i32_0 : i32, i32, i32
  }
}

</mosaic_0001>

<bundles_post_ra>
// kernel: deconvolutional_layer_forward.1
= control target key start
LH: loop header
LB: loop body
LE: loop exit
PB: predicated region body
PF: predicated region fallthrough
CT: control target
= control target key end

     0   :  { %v280_v1 = vmov 0   ;;  %vm88_vm0 = vcmask 392192   ;;  %v281_v49 = vmov 1   ;;  %s356_s0 = inlined_call_operand.vmem [shape: bf16[48,512], index: 0, kind: input, shape index: {}]   ;;  %s357_s1 = inlined_call_operand.vmem [shape: bf16[8,48], index: 1, kind: input, shape index: {}]   ;;  %s358_s2 = inlined_call_operand.vmem [shape: f32[8,2], index: 2, kind: input, shape index: {}]   ;;  %s359_s3 = inlined_call_operand.vmem [shape: f32[2,8,256], index: 3, kind: output, shape index: {}]  }
   0x1   :  { %v258_v0 = vld [vmem:[%s356_s0 + $0x44] ss:$16 sps:$4 sm:$0xff]   ;;  %124 = vmatprep.mubr.bf16.mxu0 %v280_v1  ;;  %165 = vmatprep.mubr.bf16.mxu1 %v280_v1  ;;  %v260_v2 = vld [vmem:[%s356_s0 + $0x4c] ss:$16 sps:$4 sm:$0xff]   ;;  %v262_v3 = vld [vmem:[%s356_s0 + $0x40] ss:$16 sps:$4 sm:$0xff]  }
   0x2   :  { %255 = vset.pattern.permute.xlu0 %v280_v1  ;;  %256 = vset.pattern.permute.xlu1 %v280_v1  ;;  %v263_v4 = vld [vmem:[%s356_s0 + $0x48] ss:$16 sps:$4 sm:$0xff]   ;;  %v264_v5 = vld [vmem:[%s356_s0 + $0x24] ss:$16 sps:$4 sm:$0xff]   ;;  %v266_v6 = vld [vmem:[%s356_s0 + $0x2c] ss:$16 sps:$4 sm:$0xff]  }
   0x3   :  { %102 = vmatprep.subr.bf16.mxu0 %v258_v0  ;;  %143 = vmatprep.subr.bf16.mxu1 %v260_v2  ;;  %v268_v7 = vld [vmem:[%s356_s0 + $0x20] ss:$16 sps:$4 sm:$0xff]   ;;  %v269_v8 = vld [vmem:[%s356_s0 + $0x28] ss:$16 sps:$4 sm:$0xff]   ;;  %v270_v9 = vld [vmem:[%s356_s0 + $0x4] ss:$16 sps:$4 sm:$0xff]  }
   0x4   :  { %103 = vmatpush1.bf16.msra.mxu0 %v262_v3  ;;  %144 = vmatpush1.bf16.msra.mxu1 %v263_v4  ;;  %v272_v10 = vld [vmem:[%s356_s0 + $0xc] ss:$16 sps:$4 sm:$0xff]   ;;  %v274_v11 = vld [vmem:[%s356_s0] ss:$16 sps:$4 sm:$0xff]   ;;  %v275_v12 = vld [vmem:[%s356_s0 + $0x8] ss:$16 sps:$4 sm:$0xff]  }
   0x5   :  { %104 = vmatprep.subr.bf16.mxu0 %v264_v5  ;;  %145 = vmatprep.subr.bf16.mxu1 %v266_v6  ;;  %v27_v13 = vld [vmem:[%s357_s1] sm:$0xf] }
   0x6   :  { %v174_v44 = vld [vmem:[%s358_s2] sm:$0xff] }
   0x8   :  { %105 = vmatpush1.bf16.msra.mxu0 %v268_v7  ;;  %146 = vmatpush1.bf16.msra.mxu1 %v269_v8 }
   0x9   :  { %106 = vmatprep.subr.bf16.mxu0 %v270_v9  ;;  %147 = vmatprep.subr.bf16.mxu1 %v272_v10 }
   0xc   :  { %107 = vmatpush1.bf16.msra.mxu0 %v274_v11  ;;  %148 = vmatpush1.bf16.msra.mxu1 %v275_v12 }
   0xf   :  { %249 = vmatmul.mubr.msk.bf16.vlgmr.msra.gmra.mxu0 %vm88_vm0, %v27_v13  ;;  %250 = vmatmul.mubr.msk.bf16.vlgmr.msra.gmra.mxu1 %vm88_vm0, %v27_v13 }
  0xcf   :  { %v126_v14 = vpop.f32.mrf.mxu0  ;;  %v167_v15 = vpop.f32.mrf.mxu1 }
  0xd1   :  { %v128_v16 = vpop.f32.mrf.mxu0  ;;  %v169_v17 = vpop.f32.mrf.mxu1 }
  0xd2   :  { %v175_v18 = vadd.f32 %v128_v16, %v126_v14  ;;  %v206_v23 = vadd.f32 %v169_v17, %v167_v15 }
  0xd3   :  { %v130_v19 = vpop.f32.mrf.mxu0  ;;  %v171_v20 = vpop.f32.mrf.mxu1 }
  0xd4   :  { %176 = vadd.xlane.f32.xlu0 %v175_v18 }
  0xd5   :  { %v131_v21 = vpop.f32.mrf.mxu0  ;;  %v172_v22 = vpop.f32.mrf.mxu1 }
  0xd8   :  { %207 = vadd.xlane.f32.xlu0 %v206_v23 }
 0x15d   :  { %v177_v24 = vpop.xlane.xlu0 %176 }
 0x15e   :  { %v178_v25 = vmul.f32 0.00390625, %v177_v24 }
 0x160   :  { %v179_v26 = vsub.f32 %v126_v14, %v178_v25  ;;  %v180_v27 = vsub.f32 %v128_v16, %v178_v25 }
 0x161   :  { %v208_v28 = vpop.xlane.xlu0 %207 }
 0x162   :  { %v209_v29 = vmul.f32 0.00390625, %v208_v28  ;;  %v181_v30 = vmul.f32 %v179_v26, %v179_v26  ;;  %v182_v31 = vmul.f32 %v180_v27, %v180_v27 }
 0x164   :  { %v210_v32 = vsub.f32 %v167_v15, %v209_v29  ;;  %v211_v33 = vsub.f32 %v169_v17, %v209_v29  ;;  %v183_v34 = vadd.f32 %v182_v31, %v181_v30 }
 0x166   :  { %184 = vadd.xlane.f32.xlu1 %v183_v34  ;;  %v212_v35 = vmul.f32 %v210_v32, %v210_v32  ;;  %v213_v36 = vmul.f32 %v211_v33, %v211_v33 }
 0x168   :  { %v214_v37 = vadd.f32 %v213_v36, %v212_v35 }
 0x16a   :  { %215 = vadd.xlane.f32.xlu1 %v214_v37 }
 0x1ef   :  { %v185_v38 = vpop.xlane.xlu1 %184 }
 0x1f0   :  { %v186_v39 = vmul.f32 0.00390625, %v185_v38 }
 0x1f2   :  { %v187_v40 = vadd.f32 1e-05, %v186_v39 }
 0x1f3   :  { %v216_v41 = vpop.xlane.xlu1 %215 }
 0x1f4   :  { %276 = vrsqrt.f32 %v187_v40  ;;  %v217_v42 = vmul.f32 0.00390625, %v216_v41 }
 0x1f6   :  { %v218_v43 = vadd.f32 1e-05, %v217_v42 }
 0x1f8   :  { %278 = vrsqrt.f32 %v218_v43 }
 0x201   :  { %v277_v45 = vpop.eup %276 }
 0x202   :  { %v189_v46 = vmul.f32 %v277_v45, %v174_v44 }
 0x204   :  { %192 = vperm.xlu0 %255, %v189_v46  }
 0x205   :  { %v279_v47 = vpop.eup %278 }
 0x206   :  { %v220_v48 = vmul.f32 %v279_v47, %v174_v44 }
 0x208   :  { %223 = vperm.xlu1 %256, %v220_v48  }
 0x20c   :  { %257 = vset.pattern.permute.xlu1 %v281_v49 }
 0x20d   :  { %199 = vperm.xlu1 %257, %v174_v44  }
 0x27f   :  { %v193_v51 = vpop.permute.xlu0 %192 }
 0x280   :  { %v195_v52 = vmul.f32 %v193_v51, %v179_v26  ;;  %v196_v53 = vmul.f32 %v193_v51, %v180_v27 }
 0x283   :  { %v224_v50 = vpop.permute.xlu1 %223 }
 0x284   :  { %v226_v54 = vmul.f32 %v224_v50, %v210_v32  ;;  %v227_v55 = vmul.f32 %v224_v50, %v211_v33 }
 0x288   :  { %v200_v56 = vpop.permute.xlu1 %199 }
 0x289   :  { %v202_v57 = vadd.f32 %v200_v56, %v195_v52  ;;  %v203_v58 = vadd.f32 %v200_v56, %v196_v53  ;;  %v228_v59 = vadd.f32 %v226_v54, %v200_v56  ;;  %v229_v60 = vadd.f32 %v227_v55, %v200_v56 }
 0x28b   :  { %204 = vst [vmem:[%s359_s3] sm:$0xff] %v202_v57  ;;  %205 = vst [vmem:[%s359_s3 + $0x8] sm:$0xff] %v203_v58 }
 0x28c   :  { %251 = vst [vmem:[%s359_s3 + $0x10] sm:$0xff] %v228_v59  ;;  %252 = vst [vmem:[%s359_s3 + $0x18] sm:$0xff] %v229_v60 }

</bundles_post_ra>
